<compile_context>
chip_gen: v6e
topology: v6e:2x2x1
jax: 0.10.0
libtpu: 0.0.40
codegen_flags: <defaults>
</compile_context>

<pallas_src>
import functools

import jax
import jax.numpy as jnp
from jax.experimental import pallas as pl
from jax.experimental.pallas import tpu as pltpu


def _triplet_kernel(a_ref, p_ref, n_ref, out_ref, *, margin, eps, d, k,
                    valid_rows, b_tile, need_mask):
    """One (b_tile, k*d) batch tile -> (b_tile, k) per-row triplet losses."""
    a = a_ref[...].astype(jnp.float32)
    # eps is added to the *difference* before squaring, matching
    # torch.nn.functional.pairwise_distance.
    dp = a - p_ref[...].astype(jnp.float32) + eps
    dn = a - n_ref[...].astype(jnp.float32) + eps
    sq_p = dp * dp
    sq_n = dn * dn

    if k == 1:
        pos_sq = jnp.sum(sq_p, axis=-1, keepdims=True)          # (b_tile, 1)
        neg_sq = jnp.sum(sq_n, axis=-1, keepdims=True)
    else:
        # k original rows folded onto the 128-wide lane axis; reduce each
        # contiguous d-lane segment with a one-hot matmul (MXU is idle anyway).
        lane = jax.lax.broadcasted_iota(jnp.int32, (k * d, k), 0)
        col = jax.lax.broadcasted_iota(jnp.int32, (k * d, k), 1)
        lo = col * d
        seg = ((lane >= lo) & (lane < lo + d)).astype(jnp.float32)   # (k*d, k)
        pos_sq = jnp.dot(sq_p, seg, preferred_element_type=jnp.float32)  # (b_tile, k)
        neg_sq = jnp.dot(sq_n, seg, preferred_element_type=jnp.float32)

    losses = jnp.maximum(jnp.sqrt(pos_sq) - jnp.sqrt(neg_sq) + margin, 0.0)

    if need_mask:
        # Ragged tail (no HBM padding): rows >= valid_rows hold unspecified
        # VMEM data; a select guarantees garbage/NaN never reaches the sum.
        row = (jax.lax.broadcasted_iota(jnp.int32, losses.shape, 0)
               + pl.program_id(0) * b_tile)
        losses = jnp.where(row < valid_rows, losses, 0.0)

    out_ref[...] = losses


def _vmem_limit_bytes():
    """Per-generation scoped-VMEM budget (conservative if query fails)."""
    try:
        cap = int(pltpu.get_tpu_info().vmem_capacity_bytes)
    except Exception:
        cap = 64 * 1024 * 1024
    if cap >= 128 * 1024 * 1024:       # v5e / v6e: 128 MiB physical
        return 100 * 1024 * 1024
    return 48 * 1024 * 1024            # v7x: 64 MiB physical per TensorCore


def triplet_loss(anchor, positive, negative, margin=1.0, eps=1e-6, b_tile=None):
    """Pallas TPU TripletLoss.forward: mean(relu(d(a,p) - d(a,n) + margin))."""
    assert anchor.shape == positive.shape == negative.shape
    assert anchor.ndim == 2, "expected (batch, features) inputs"
    B, D = anchor.shape
    itemsize = jnp.dtype(anchor.dtype).itemsize

    # ---- lane-density fold: pack k rows into one 128-lane row when D < 128 ----
    k = 1
    if D < 128 and 128 % D == 0 and B % (128 // D) == 0:
        k = 128 // D
    b_rows = B // k                    # rows as seen by the kernel
    d_eff = D * k                      # kernel feature width (=128 when folded)
    if k > 1:
        anchor = anchor.reshape(b_rows, d_eff)       # free: row-major contiguous
        positive = positive.reshape(b_rows, d_eff)
        negative = negative.reshape(b_rows, d_eff)
    # TODO(synk): D > 128 with D % 128 != 0 runs with lane-padded tiles (correct,
    # just slightly wasteful); could pad D up to a multiple of 128 if it matters.

    vmem_limit = _vmem_limit_bytes()

    # ---- bytes-based batch tile (multi-MiB DMA per grid step) ----
    if b_tile is None:
        d_pad = pl.cdiv(d_eff, 128) * 128            # lane padding in VMEM
        per_row = (3 * 2 * d_pad * itemsize          # 3 inputs, double-buffered
                   + 6 * d_pad * 4                   # live f32 temporaries
                   + 2 * 128 * 4)                    # lane-padded output blocks
        b_tile = int((vmem_limit * 6 // 10) // per_row)
    b_tile = max(1, min(int(b_tile), b_rows))
    if b_tile < b_rows:
        b_tile = min(max(8, (b_tile // 8) * 8), b_rows)   # sub-full blocks: x8

    grid = pl.cdiv(b_rows, b_tile)
    rows_out = grid * b_tile
    need_mask = rows_out != b_rows

    kernel = functools.partial(
        _triplet_kernel, margin=float(margin), eps=float(eps), d=D, k=k,
        valid_rows=b_rows, b_tile=b_tile, need_mask=need_mask)

    in_spec = pl.BlockSpec((b_tile, d_eff), lambda i: (i, 0))
    out_spec = pl.BlockSpec((b_tile, k), lambda i: (i, 0))

    cost = pl.CostEstimate(
        flops=int(B * (8 * D + 6)),
        transcendentals=int(2 * B),
        bytes_accessed=int(3 * B * D * itemsize + rows_out * k * 4))

    per_row_losses = pl.pallas_call(
        kernel,
        out_shape=jax.ShapeDtypeStruct((rows_out, k), jnp.float32),
        grid=(grid,),
        in_specs=[in_spec, in_spec, in_spec],
        out_specs=out_spec,
        compiler_params=pltpu.CompilerParams(
            dimension_semantics=("parallel",),   # no carried state -> megacore ok
            vmem_limit_bytes=vmem_limit),
        cost_estimate=cost,
    )(anchor, positive, negative)

    # Tiny (~B floats) final reduction; masked tail rows are exact zeros.
    return jnp.sum(per_row_losses) * jnp.float32(1.0 / B)


def _ref_triplet(anchor, positive, negative, margin=1.0, eps=1e-6):
    """Pure-JAX reference mirroring F.pairwise_distance / F.relu / mean."""
    a = anchor.astype(jnp.float32)
    p = positive.astype(jnp.float32)
    n = negative.astype(jnp.float32)
    pos = jnp.sqrt(jnp.sum((a - p + eps) ** 2, axis=-1))
    neg = jnp.sqrt(jnp.sum((a - n + eps) ** 2, axis=-1))
    return jnp.mean(jnp.maximum(pos - neg + margin, 0.0))


if __name__ == "__main__":
    # 1) D < 128: exercises the lane-density fold (k = 4), single full block.
    B1, D1 = 64, 32
    ka, kp, kn = jax.random.split(jax.random.PRNGKey(0), 3)
    a1 = jax.random.normal(ka, (B1, D1), jnp.float32)
    p1 = jax.random.normal(kp, (B1, D1), jnp.float32)
    n1 = jax.random.normal(kn, (B1, D1), jnp.float32)
    out1 = jax.block_until_ready(triplet_loss(a1, p1, n1, margin=1.0))
    ref1 = jax.block_until_ready(_ref_triplet(a1, p1, n1, margin=1.0))
    assert out1.shape == ()
    assert jnp.allclose(out1, ref1, atol=1e-5, rtol=1e-5), (out1, ref1)

    # 2) D = 128, ragged batch, no wrapper pad: grid of 4 with a masked tail.
    B2, D2 = 200, 128
    k4, k5, k6 = jax.random.split(jax.random.PRNGKey(1), 3)
    a2 = jax.random.normal(k4, (B2, D2), jnp.float32)
    p2 = jax.random.normal(k5, (B2, D2), jnp.float32)
    n2 = jax.random.normal(k6, (B2, D2), jnp.float32)
    out2 = jax.block_until_ready(triplet_loss(a2, p2, n2, margin=1.0, b_tile=64))
    ref2 = jax.block_until_ready(_ref_triplet(a2, p2, n2, margin=1.0))
    assert jnp.allclose(out2, ref2, atol=2e-5, rtol=2e-5), (out2, ref2)

    # 3) bf16 inputs + fold + ragged grid (in-kernel f32 upcast).
    B3, D3 = 40, 32
    k7, k8, k9 = jax.random.split(jax.random.PRNGKey(2), 3)
    a3 = jax.random.normal(k7, (B3, D3), jnp.float32).astype(jnp.bfloat16)
    p3 = jax.random.normal(k8, (B3, D3), jnp.float32).astype(jnp.bfloat16)
    n3 = jax.random.normal(k9, (B3, D3), jnp.float32).astype(jnp.bfloat16)
    out3 = jax.block_until_ready(triplet_loss(a3, p3, n3, margin=1.0, b_tile=8))
    ref3 = jax.block_until_ready(_ref_triplet(a3, p3, n3, margin=1.0))
    assert jnp.allclose(out3, ref3, atol=1e-4, rtol=1e-4), (out3, ref3)

    print("KERNEL_OK")
</pallas_src>

<mosaic_0001>
module attributes {stable_mosaic.version = 11 : i64} {
  func.func @_triplet_kernel(%arg0: i32, %arg1: memref<16x128xf32, #tpu.memory_space<vmem>>, %arg2: memref<16x128xf32, #tpu.memory_space<vmem>>, %arg3: memref<16x128xf32, #tpu.memory_space<vmem>>, %arg4: memref<16x4xf32, #tpu.memory_space<vmem>>) attributes {dimension_semantics = [#tpu.dimension_semantics<parallel>], iteration_bounds = array<i64: 1>, scalar_prefetch = 0 : i64, scratch_operands = 0 : i64, tpu.core_type = #tpu.core_type<tc>, window_params = [{transform_indices = @transform_0, window_bounds = array<i64: 16, 128>}, {transform_indices = @transform_1, window_bounds = array<i64: 16, 128>}, {transform_indices = @transform_2, window_bounds = array<i64: 16, 128>}, {transform_indices = @transform_3, window_bounds = array<i64: 16, 4>}]} {
    %c0 = arith.constant 0 : index
    %c0_0 = arith.constant 0 : index
    %0 = vector.load %arg1[%c0, %c0_0] : memref<16x128xf32, #tpu.memory_space<vmem>>, vector<16x128xf32>
    %c0_1 = arith.constant 0 : index
    %c0_2 = arith.constant 0 : index
    %1 = vector.load %arg2[%c0_1, %c0_2] : memref<16x128xf32, #tpu.memory_space<vmem>>, vector<16x128xf32>
    %2 = arith.subf %0, %1 : vector<16x128xf32>
    %cst = arith.constant 9.99999997E-7 : f32
    %3 = vector.broadcast %cst : f32 to vector<16x128xf32>
    %4 = arith.addf %2, %3 : vector<16x128xf32>
    %c0_3 = arith.constant 0 : index
    %c0_4 = arith.constant 0 : index
    %5 = vector.load %arg3[%c0_3, %c0_4] : memref<16x128xf32, #tpu.memory_space<vmem>>, vector<16x128xf32>
    %6 = arith.subf %0, %5 : vector<16x128xf32>
    %cst_5 = arith.constant 9.99999997E-7 : f32
    %7 = vector.broadcast %cst_5 : f32 to vector<16x128xf32>
    %8 = arith.addf %6, %7 : vector<16x128xf32>
    %9 = arith.mulf %4, %4 : vector<16x128xf32>
    %10 = arith.mulf %8, %8 : vector<16x128xf32>
    %11 = tpu.iota {dimensions = array<i32: 0>} : vector<128x4xi32>
    %12 = tpu.iota {dimensions = array<i32: 1>} : vector<128x4xi32>
    %c32_i32 = arith.constant 32 : i32
    %13 = vector.broadcast %c32_i32 : i32 to vector<128x4xi32>
    %14 = arith.muli %12, %13 : vector<128x4xi32>
    %15 = arith.cmpi sge, %11, %14 : vector<128x4xi32>
    %c32_i32_6 = arith.constant 32 : i32
    %16 = vector.broadcast %c32_i32_6 : i32 to vector<128x4xi32>
    %17 = arith.addi %14, %16 : vector<128x4xi32>
    %18 = arith.cmpi slt, %11, %17 : vector<128x4xi32>
    %19 = arith.andi %15, %18 : vector<128x4xi1>
    %20 = arith.extui %19 : vector<128x4xi1> to vector<128x4xi32>
    %21 = arith.sitofp %20 : vector<128x4xi32> to vector<128x4xf32>
    %cst_7 = arith.constant dense<0.000000e+00> : vector<16x4xf32>
    %22 = tpu.matmul %9, %21, %cst_7 {dimension_numbers = #tpu.dot_dimension_numbers<[1], [0], [0], [1], [0, 0, 1, 1], [], []>} : vector<16x128xf32>, vector<128x4xf32>, vector<16x4xf32> -> vector<16x4xf32>
    %cst_8 = arith.constant dense<0.000000e+00> : vector<16x4xf32>
    %23 = tpu.matmul %10, %21, %cst_8 {dimension_numbers = #tpu.dot_dimension_numbers<[1], [0], [0], [1], [0, 0, 1, 1], [], []>} : vector<16x128xf32>, vector<128x4xf32>, vector<16x4xf32> -> vector<16x4xf32>
    %24 = math.sqrt %22 : vector<16x4xf32>
    %25 = math.sqrt %23 : vector<16x4xf32>
    %26 = arith.subf %24, %25 : vector<16x4xf32>
    %cst_9 = arith.constant 1.000000e+00 : f32
    %27 = vector.broadcast %cst_9 : f32 to vector<16x4xf32>
    %28 = arith.addf %26, %27 : vector<16x4xf32>
    %cst_10 = arith.constant 0.000000e+00 : f32
    %29 = vector.broadcast %cst_10 : f32 to vector<16x4xf32>
    %30 = arith.maximumf %28, %29 : vector<16x4xf32>
    %c0_11 = arith.constant 0 : index
    %c0_12 = arith.constant 0 : index
    %31 = vector.load %arg4[%c0_11, %c0_12] : memref<16x4xf32, #tpu.memory_space<vmem>>, vector<16x4xf32>
    tpu.vector_store %arg4[%c0_11, %c0_12], %30 {strides = array<i32>} : memref<16x4xf32, #tpu.memory_space<vmem>>, vector<16x4xf32>,
    return
  }
  func.func @transform_0(%arg0: i32) -> (i32, i32) {
    %c0_i32 = arith.constant 0 : i32
    %c0_i32_0 = arith.constant 0 : i32
    return %arg0, %c0_i32 : i32, i32
  }
  func.func @transform_1(%arg0: i32) -> (i32, i32) {
    %c0_i32 = arith.constant 0 : i32
    %c0_i32_0 = arith.constant 0 : i32
    return %arg0, %c0_i32 : i32, i32
  }
  func.func @transform_2(%arg0: i32) -> (i32, i32) {
    %c0_i32 = arith.constant 0 : i32
    %c0_i32_0 = arith.constant 0 : i32
    return %arg0, %c0_i32 : i32, i32
  }
  func.func @transform_3(%arg0: i32) -> (i32, i32) {
    %c0_i32 = arith.constant 0 : i32
    %c0_i32_0 = arith.constant 0 : i32
    return %arg0, %c0_i32 : i32, i32
  }
}

</mosaic_0001>

<bundles_post_ra>
// kernel: tpu_custom_call.1
= control target key start
LH: loop header
LB: loop body
LE: loop exit
PB: predicated region body
PF: predicated region fallthrough
CT: control target
= control target key end

     0   :  { %8 = vsyncpa [#allocation3], 0  ;;  %s830_s0 = inlined_call_operand.hbm [shape: f32[16,128], index: 0, kind: input, shape index: {}]   ;;  %s831_s1 = inlined_call_operand.hbm [shape: f32[16,128], index: 1, kind: input, shape index: {}]   ;;  %s832_s2 = inlined_call_operand.hbm [shape: f32[16,128], index: 2, kind: input, shape index: {}]   ;;  %s833_s3 = inlined_call_operand.vmem [shape: f32[16,4], index: 3, kind: output, shape index: {}]  }
   0x1   :  { %9 = vsyncpa [#allocation5], 0  ;;  %s599_s12 = smov [#allocation4]   ;;  %s600_s14 = smov [#allocation2]  }
   0x2   :  { %s27_s13 = sshll.u32 %s599_s12, 4  ;;  %s15_s15 = sshll.u32 %s600_s14, 4  ;;  %s28_s13 = int_to_ptr.vmem [resolvable:$true] %s27_s13  ;;  %s16_s15 = int_to_ptr.vmem [resolvable:$true] %s15_s15 }
   0x3   :  { %s543_s16 = scalar_lea.vmem %s28_s13, 256  ;;  %p548_p1 = scmp.lt.s32.totalorder %s28_s13, %s28_s13 }
   0x4   :  { %p544_p0 = scmp.ne.s32.totalorder %s28_s13, %s543_s16  ;;  %p549_p2 = scmp.lt.s32.totalorder %s543_s16, %s543_s16 }
   0x6   :  { %p550_p3 = por %p549_p2, %p548_p1 }
   0x8   :  { %p551_p4 = pnand %p550_p3, %p544_p0 }
   0xa   :  { %554 = shalt.err (!%p551_p4)
}
   0xb   :  { %s601_s17 = smov 128   ;;  %s602_s18 = smov 8  }
   0xc   :  { %33 = dma.hbm_to_vmem [thread:$0]  %s831_s1, 256, %s28_s13, [#allocation5], %s601_s17, %s601_s17, %s602_s18  }
   0xd   :  { %s563_s21 = scalar_lea.vmem %s16_s15, 256  ;;  %p568_p6 = scmp.lt.s32.totalorder %s16_s15, %s16_s15 }
   0xe   :  { %p564_p5 = scmp.ne.s32.totalorder %s16_s15, %s563_s21  ;;  %p569_p7 = scmp.lt.s32.totalorder %s563_s21, %s563_s21 }
  0x10   :  { %p570_p8 = por %p569_p7, %p568_p6 }
  0x12   :  { %p571_p9 = pnand %p570_p8, %p564_p5 }
  0x14   :  { %574 = shalt.err (!%p571_p9)
}
  0x15   :  { %21 = dma.hbm_to_vmem [thread:$0]  %s830_s0, 256, %s16_s15, [#allocation3], %s601_s17, %s601_s17, %s602_s18  }
  0x16   :  { %s603_s24 = smov [#allocation6]  }
  0x17   :  { %s39_s25 = sshll.u32 %s603_s24, 4  ;;  %s40_s25 = int_to_ptr.vmem [resolvable:$true] %s39_s25 }
  0x18   :  { %s583_s26 = scalar_lea.vmem %s40_s25, 256  ;;  %p588_p11 = scmp.lt.s32.totalorder %s40_s25, %s40_s25 }
  0x19   :  { %p584_p10 = scmp.ne.s32.totalorder %s40_s25, %s583_s26  ;;  %p589_p12 = scmp.lt.s32.totalorder %s583_s26, %s583_s26 }
  0x1b   :  { %p590_p13 = por %p589_p12, %p588_p11 }
  0x1d   :  { %p591_p0 = pnand %p590_p13, %p584_p10 }
  0x1f   :  { %594 = shalt.err (!%p591_p0)
}
  0x20   :  { %45 = dma.hbm_to_vmem [thread:$0]  %s832_s2, 256, %s40_s25, [#allocation5], %s601_s17, %s601_s17, %s602_s18  }
  0x21   :  { %595 = dma.done.wait [#allocation3], 256  }
  0x22   :  { %596 = vsyncadd [#allocation3], 4294967040  ;;  %v73_v0 = vlaneseq }
  0x23   :  { %597 = dma.done.wait [#allocation5], 512  }
  0x24   :  { %598 = vsyncadd [#allocation5], 4294966784  ;;  %v634_v1 = vshrl.u32 %v73_v0, 7  ;;  %v91_v2 = vand.u32 127, %v73_v0  ;;  %v604_v10 = vmov 1.0   ;;  %v55_v22 = vld [vmem:[#allocation2] sm:$0xff] }
  0x25   :  { %v57_v23 = vld [vmem:[#allocation4] sm:$0xff]  ;;  %v63_v25 = vld [vmem:[#allocation6] sm:$0xff]  ;;  %v56_v27 = vld [vmem:[#allocation2 + $0x8] sm:$0xff] }
  0x26   :  { %v89_v3 = vadd.s32 120, %v634_v1  ;;  %v637_v4 = vmul.u32 32, %v91_v2  ;;  %v88_v5 = vadd.s32 112, %v634_v1  ;;  %v87_v6 = vadd.s32 104, %v634_v1  ;;  %v58_v28 = vld [vmem:[#allocation4 + $0x8] sm:$0xff]  ;;  %v64_v29 = vld [vmem:[#allocation6 + $0x8] sm:$0xff] }
  0x27   :  { %v86_v8 = vadd.s32 96, %v634_v1  ;;  %v85_v9 = vadd.s32 88, %v634_v1  ;;  %v84_v11 = vadd.s32 80, %v634_v1  ;;  %v83_v12 = vadd.s32 72, %v634_v1 }
  0x28   :  { %vm108_vm0 = vcmp.ge.s32.totalorder %v89_v3, %v637_v4  ;;  %v643_v7 = vadd.s32 32, %v637_v4  ;;  %vm107_vm1 = vcmp.ge.s32.totalorder %v88_v5, %v637_v4  ;;  %vm106_vm4 = vcmp.ge.s32.totalorder %v87_v6, %v637_v4 }
  0x29   :  { %vm105_vm8 = vcmp.ge.s32.totalorder %v86_v8, %v637_v4  ;;  %vm104_vm11 = vcmp.ge.s32.totalorder %v85_v9, %v637_v4  ;;  %vm103_vm14 = vcmp.ge.s32.totalorder %v84_v11, %v637_v4  ;;  %v82_v13 = vadd.s32 64, %v634_v1 }
  0x2a   :  { %vm125_vm2 = vcmp.lt.s32.totalorder %v89_v3, %v643_v7  ;;  %vm124_vm3 = vcmp.lt.s32.totalorder %v88_v5, %v643_v7  ;;  %vm123_vm5 = vcmp.lt.s32.totalorder %v87_v6, %v643_v7  ;;  %vm122_vm9 = vcmp.lt.s32.totalorder %v86_v8, %v643_v7 }
  0x2b   :  { %vm141_vm6 = vmand %vm108_vm0, %vm125_vm2  ;;  %vm121_vm12 = vcmp.lt.s32.totalorder %v85_v9, %v643_v7  ;;  %vm120_vm15 = vcmp.lt.s32.totalorder %v84_v11, %v643_v7  ;;  %vm119_vm2 = vcmp.lt.s32.totalorder %v83_v12, %v643_v7  ;;  %v81_v14 = vadd.s32 56, %v634_v1 }
  0x2c   :  { %451 = vmatprep.subr.msk.mxu0 %vm141_vm6, %v604_v10  ;;  %486 = vmatprep.subr.msk.mxu1 %vm141_vm6, %v604_v10  ;;  %vm140_vm7 = vmand %vm107_vm1, %vm124_vm3  ;;  %vm102_vm1 = vcmp.ge.s32.totalorder %v83_v12, %v637_v4  ;;  %v80_v15 = vadd.s32 48, %v634_v1  ;;  %v79_v16 = vadd.s32 40, %v634_v1  ;;  %v78_v17 = vadd.s32 32, %v634_v1 }
  0x2d   :  { %452 = vmatpush3.msk.msra.mxu0 %vm141_vm6, %v604_v10  ;;  %487 = vmatpush3.msk.msra.mxu1 %vm141_vm6, %v604_v10  ;;  %vm139_vm10 = vmand %vm106_vm4, %vm123_vm5  ;;  %vm101_vm4 = vcmp.ge.s32.totalorder %v82_v13, %v637_v4  ;;  %vm118_vm5 = vcmp.lt.s32.totalorder %v82_v13, %v643_v7  ;;  %v77_v19 = vadd.s32 24, %v634_v1  ;;  %v76_v21 = vadd.s32 16, %v634_v1 }
  0x2e   :  { %453 = vmatprep.subr.msk.mxu0 %vm140_vm7, %v604_v10  ;;  %488 = vmatprep.subr.msk.mxu1 %vm140_vm7, %v604_v10  ;;  %vm138_vm13 = vmand %vm105_vm8, %vm122_vm9  ;;  %vm117_vm8 = vcmp.lt.s32.totalorder %v81_v14, %v643_v7  ;;  %v75_v26 = vadd.s32 8, %v634_v1  ;;  %v59_v31 = vsub.f32 %v55_v22, %v57_v23  ;;  %v65_v32 = vsub.f32 %v55_v22, %v63_v25 }
  0x2f   :  { %454 = vmatpush3.msk.msra.mxu0 %vm140_vm7, %v604_v10  ;;  %489 = vmatpush3.msk.msra.mxu1 %vm140_vm7, %v604_v10  ;;  %vm137_vm0 = vmand %vm104_vm11, %vm121_vm12  ;;  %vm100_vm7 = vcmp.ge.s32.totalorder %v81_v14, %v637_v4  ;;  %vm116_vm11 = vcmp.lt.s32.totalorder %v80_v15, %v643_v7  ;;  %v60_v34 = vsub.f32 %v56_v27, %v58_v28 }
  0x30   :  { %455 = vmatprep.subr.msk.mxu0 %vm139_vm10, %v604_v10  ;;  %490 = vmatprep.subr.msk.mxu1 %vm139_vm10, %v604_v10  ;;  %vm136_vm3 = vmand %vm103_vm14, %vm120_vm15  ;;  %vm115_vm14 = vcmp.lt.s32.totalorder %v79_v16, %v643_v7  ;;  %v66_v35 = vsub.f32 %v56_v27, %v64_v29  ;;  %v61_v36 = vadd.f32 1e-06, %v59_v31  ;;  %v67_v37 = vadd.f32 1e-06, %v65_v32 }
  0x31   :  { %456 = vmatpush3.msk.msra.mxu0 %vm139_vm10, %v604_v10  ;;  %491 = vmatpush3.msk.msra.mxu1 %vm139_vm10, %v604_v10  ;;  %vm135_vm6 = vmand %vm102_vm1, %vm119_vm2  ;;  %vm99_vm10 = vcmp.ge.s32.totalorder %v80_v15, %v637_v4  ;;  %vm114_vm1 = vcmp.lt.s32.totalorder %v78_v17, %v643_v7  ;;  %v62_v38 = vadd.f32 1e-06, %v60_v34 }
  0x32   :  { %457 = vmatprep.subr.msk.mxu0 %vm138_vm13, %v604_v10  ;;  %492 = vmatprep.subr.msk.mxu1 %vm138_vm13, %v604_v10  ;;  %vm134_vm9 = vmand %vm101_vm4, %vm118_vm5  ;;  %vm113_vm4 = vcmp.lt.s32.totalorder %v77_v19, %v643_v7  ;;  %v68_v39 = vadd.f32 1e-06, %v66_v35  ;;  %v69_v40 = vmul.f32 %v61_v36, %v61_v36  ;;  %v71_v41 = vmul.f32 %v67_v37, %v67_v37 }
  0x33   :  { %458 = vmatpush3.msk.msra.mxu0 %vm138_vm13, %v604_v10  ;;  %493 = vmatpush3.msk.msra.mxu1 %vm138_vm13, %v604_v10  ;;  %vm701_vm12 = vmand %vm100_vm7, %vm117_vm8  ;;  %vm98_vm13 = vcmp.ge.s32.totalorder %v79_v16, %v637_v4  ;;  %vm112_vm7 = vcmp.lt.s32.totalorder %v76_v21, %v643_v7  ;;  %v70_v42 = vmul.f32 %v62_v38, %v62_v38 }
  0x34   :  { %459 = vmatprep.subr.msk.mxu0 %vm137_vm0, %v604_v10  ;;  %494 = vmatprep.subr.msk.mxu1 %vm137_vm0, %v604_v10  ;;  %vm712_vm15 = vmand %vm99_vm10, %vm116_vm11  ;;  %vm111_vm10 = vcmp.lt.s32.totalorder %v75_v26, %v643_v7  ;;  %v72_v43 = vmul.f32 %v68_v39, %v68_v39 }
  0x35   :  { %460 = vmatpush3.msk.msra.mxu0 %vm137_vm0, %v604_v10  ;;  %495 = vmatpush3.msk.msra.mxu1 %vm137_vm0, %v604_v10  ;;  %vm97_vm0 = vcmp.ge.s32.totalorder %v78_v17, %v637_v4  ;;  %vm733_vm2 = vmand %vm98_vm13, %vm115_vm14  ;;  %vm110_vm13 = vcmp.lt.s32.totalorder %v634_v1, %v643_v7 }
  0x36   :  { %461 = vmatprep.subr.msk.mxu0 %vm136_vm3, %v604_v10  ;;  %496 = vmatprep.subr.msk.mxu1 %vm136_vm3, %v604_v10  ;;  %vm756_vm5 = vmand %vm97_vm0, %vm114_vm1 }
  0x37   :  { %462 = vmatpush3.msk.msra.mxu0 %vm136_vm3, %v604_v10  ;;  %497 = vmatpush3.msk.msra.mxu1 %vm136_vm3, %v604_v10  ;;  %vm96_vm3 = vcmp.ge.s32.totalorder %v77_v19, %v637_v4 }
  0x38   :  { %463 = vmatprep.subr.msk.mxu0 %vm135_vm6, %v604_v10  ;;  %498 = vmatprep.subr.msk.mxu1 %vm135_vm6, %v604_v10  ;;  %vm778_vm8 = vmand %vm96_vm3, %vm113_vm4 }
  0x39   :  { %464 = vmatpush3.msk.msra.mxu0 %vm135_vm6, %v604_v10  ;;  %499 = vmatpush3.msk.msra.mxu1 %vm135_vm6, %v604_v10  ;;  %vm95_vm6 = vcmp.ge.s32.totalorder %v76_v21, %v637_v4 }
  0x3a   :  { %465 = vmatprep.subr.msk.mxu0 %vm134_vm9, %v604_v10  ;;  %500 = vmatprep.subr.msk.mxu1 %vm134_vm9, %v604_v10  ;;  %vm128_vm11 = vmand %vm95_vm6, %vm112_vm7 }
  0x3b   :  { %466 = vmatpush3.msk.msra.mxu0 %vm134_vm9, %v604_v10  ;;  %501 = vmatpush3.msk.msra.mxu1 %vm134_vm9, %v604_v10  ;;  %vm94_vm9 = vcmp.ge.s32.totalorder %v75_v26, %v637_v4 }
  0x3c   :  { %467 = vmatprep.subr.msk.mxu0 %vm701_vm12, %v604_v10  ;;  %502 = vmatprep.subr.msk.mxu1 %vm701_vm12, %v604_v10  ;;  %vm127_vm14 = vmand %vm94_vm9, %vm111_vm10 }
  0x3d   :  { %468 = vmatpush3.msk.msra.mxu0 %vm701_vm12, %v604_v10  ;;  %503 = vmatpush3.msk.msra.mxu1 %vm701_vm12, %v604_v10  ;;  %vm93_vm12 = vcmp.ge.s32.totalorder %v634_v1, %v637_v4 }
  0x3e   :  { %469 = vmatprep.subr.msk.mxu0 %vm712_vm15, %v604_v10  ;;  %504 = vmatprep.subr.msk.mxu1 %vm712_vm15, %v604_v10 }
  0x3f   :  { %470 = vmatpush3.msk.msra.mxu0 %vm712_vm15, %v604_v10  ;;  %505 = vmatpush3.msk.msra.mxu1 %vm712_vm15, %v604_v10  ;;  %vm126_vm15 = vmand %vm93_vm12, %vm110_vm13 }
  0x40   :  { %471 = vmatprep.subr.msk.mxu0 %vm733_vm2, %v604_v10  ;;  %506 = vmatprep.subr.msk.mxu1 %vm733_vm2, %v604_v10 }
  0x41   :  { %472 = vmatpush3.msk.msra.mxu0 %vm733_vm2, %v604_v10  ;;  %507 = vmatpush3.msk.msra.mxu1 %vm733_vm2, %v604_v10 }
  0x42   :  { %473 = vmatprep.subr.msk.mxu0 %vm756_vm5, %v604_v10  ;;  %508 = vmatprep.subr.msk.mxu1 %vm756_vm5, %v604_v10 }
  0x43   :  { %474 = vmatpush3.msk.msra.mxu0 %vm756_vm5, %v604_v10  ;;  %509 = vmatpush3.msk.msra.mxu1 %vm756_vm5, %v604_v10 }
  0x44   :  { %475 = vmatprep.subr.msk.mxu0 %vm778_vm8, %v604_v10  ;;  %510 = vmatprep.subr.msk.mxu1 %vm778_vm8, %v604_v10 }
  0x45   :  { %476 = vmatpush3.msk.msra.mxu0 %vm778_vm8, %v604_v10  ;;  %511 = vmatpush3.msk.msra.mxu1 %vm778_vm8, %v604_v10  ;;  %vm358_vm8 = vcmask 31744  }
  0x46   :  { %477 = vmatprep.subr.msk.mxu0 %vm128_vm11, %v604_v10  ;;  %512 = vmatprep.subr.msk.mxu1 %vm128_vm11, %v604_v10 }
  0x47   :  { %478 = vmatpush3.msk.msra.mxu0 %vm128_vm11, %v604_v10  ;;  %513 = vmatpush3.msk.msra.mxu1 %vm128_vm11, %v604_v10 }
  0x48   :  { %479 = vmatprep.subr.msk.mxu0 %vm127_vm14, %v604_v10  ;;  %514 = vmatprep.subr.msk.mxu1 %vm127_vm14, %v604_v10 }
  0x49   :  { %480 = vmatpush3.msk.msra.mxu0 %vm127_vm14, %v604_v10  ;;  %515 = vmatpush3.msk.msra.mxu1 %vm127_vm14, %v604_v10 }
  0x4a   :  { %481 = vmatprep.subr.msk.mxu0 %vm126_vm15, %v604_v10  ;;  %516 = vmatprep.subr.msk.mxu1 %vm126_vm15, %v604_v10 }
  0x4b   :  { %482 = vmatpush3.msk.msra.mxu0 %vm126_vm15, %v604_v10  ;;  %483 = vmatprep.mubr.f32.mxu0 %v69_v40 }
  0x4c   :  { %517 = vmatpush3.msk.msra.mxu1 %vm126_vm15, %v604_v10  ;;  %518 = vmatprep.mubr.f32.mxu1 %v71_v41 }
  0x4d   :  { %484 = vmatmul.mubr.f32.vlgmr.msra.gmra.mxu0 %v70_v42  ;;  %519 = vmatmul.mubr.f32.vlgmr.msra.gmra.mxu1 %v72_v43 }
 0x10d   :  { %v485_v44 = vpop.f32.mrf.mxu0  ;;  %v520_v45 = vpop.f32.mrf.mxu1 }
 0x10e   :  { %527 = vrsqrt.f32 %v485_v44  ;;  %vm333_vm0 = vcmp.eq.f32.partialorder %v485_v44, inf  ;;  %vm335_vm1 = vcmp.eq.f32.partialorder %v485_v44, 0.0  ;;  %v336_v51 = vand.u32 2147483648, %v485_v44 }
 0x10f   :  { %529 = vrsqrt.f32 %v520_v45  ;;  %v240_v46 = vpop.f32.mrf.mxu0  ;;  %v315_v47 = vpop.f32.mrf.mxu1  ;;  %vm347_vm2 = vcmp.eq.f32.partialorder %v520_v45, inf  ;;  %vm349_vm3 = vcmp.eq.f32.partialorder %v520_v45, 0.0  ;;  %v350_v54 = vand.u32 2147483648, %v520_v45 }
 0x110   :  { %531 = vrsqrt.f32 %v240_v46  ;;  %vm326_vm4 = vcmp.eq.f32.partialorder %v240_v46, inf  ;;  %vm328_vm5 = vcmp.eq.f32.partialorder %v240_v46, 0.0  ;;  %v329_v60 = vand.u32 2147483648, %v240_v46 }
 0x111   :  { %533 = vrsqrt.f32 %v315_v47  ;;  %vm340_vm6 = vcmp.eq.f32.partialorder %v315_v47, inf  ;;  %v343_v0 = vand.u32 2147483648, %v315_v47  ;;  %vm342_vm7 = vcmp.eq.f32.partialorder %v315_v47, 0.0 }
 0x11b   :  { %v528_v48 = vpop.eup %527 }
 0x11c   :  { %v530_v49 = vpop.eup %529  ;;  %v332_v50 = vmul.f32 %v528_v48, %v485_v44 }
 0x11d   :  { %v532_v52 = vpop.eup %531  ;;  %v346_v53 = vmul.f32 %v530_v49, %v520_v45 }
 0x11e   :  { %v534_v55 = vpop.eup %533  ;;  %v334_v56 = vsel %vm333_vm0, %v485_v44, %v332_v50  ;;  %v325_v57 = vmul.f32 %v532_v52, %v240_v46 }
 0x11f   :  { %v337_v58 = vsel %vm335_vm1, %v336_v51, %v334_v56  ;;  %v348_v59 = vsel %vm347_vm2, %v520_v45, %v346_v53  ;;  %v339_v61 = vmul.f32 %v534_v55, %v315_v47 }
 0x120   :  { %v351_v62 = vsel %vm349_vm3, %v350_v54, %v348_v59  ;;  %v327_v63 = vsel %vm326_vm4, %v240_v46, %v325_v57 }
 0x121   :  { %v353_v1 = vsub.f32 %v337_v58, %v351_v62  ;;  %v330_v2 = vsel %vm328_vm5, %v329_v60, %v327_v63  ;;  %v341_v3 = vsel %vm340_vm6, %v315_v47, %v339_v61 }
 0x122   :  { %v344_v4 = vsel %vm342_vm7, %v343_v0, %v341_v3 }
 0x123   :  { %v355_v5 = vadd.f32 1.0, %v353_v1  ;;  %v352_v6 = vsub.f32 %v330_v2, %v344_v4 }
 0x125   :  { %v357_v7 = vmax.f32 %v355_v5, 0.0  ;;  %v354_v8 = vadd.f32 1.0, %v352_v6 }
 0x127   :  { %v356_v9 = vmax.f32 %v354_v8, 0.0  ;;  %360 = vst.msk [vmem:[%s833_s3 + $0x8] sm:$0xff] %vm358_vm8, %v357_v7 }
 0x129   :  { %359 = vst.msk [vmem:[%s833_s3] sm:$0xff] %vm358_vm8, %v356_v9 }
 0x12a   :  { %365 = vsyncpa [#allocation3], 1 }
 0x12b   :  { %366 = vsyncpa [#allocation5], 1 }

</bundles_post_ra>
